<compile_context>
chip_gen: v7x
topology: tpu7x:2x2x1
jax: 0.10.0
libtpu: 0.0.40
codegen_flags: <defaults>
</compile_context>

<pallas_src>
import math

import numpy as np
import jax
import jax.numpy as jnp
from jax.experimental import pallas as pl
from jax.experimental.pallas import tpu as pltpu


def _round_up(a: int, b: int) -> int:
    return -(-a // b) * b


def _cdiv(a: int, b: int) -> int:
    return -(-a // b)


def _norm_kernel(x_ref, scale_ref, bias_ref, o_ref):
    # y = x * (1/std) + (-mean/std); scale/bias are (1, L) f32 rows broadcast
    # over the (block_rows, L) tile; result cast back to the payload dtype.
    o_ref[...] = (x_ref[...] * scale_ref[...] + bias_ref[...]).astype(o_ref.dtype)


def normalise_one(x, scale_row, bias_row, *, max_block_bytes=8 * 1024 * 1024,
                  target_min_blocks=4, vmem_limit_bytes=48 * 1024 * 1024):
    """Normalise one array with a single lane-dense pallas_call.

    The array is viewed as a (rows, L) slab where L = lcm(d, 128) (d = feature
    count, baked into the pre-tiled scale/bias rows), so every store is a
    full-width lane-dense vst and the per-element scale pattern depends only on
    the lane index. Only the ragged tail (< L elements) ever gets padded.
    """
    shape = x.shape
    dtype = jnp.dtype(x.dtype)
    itemsize = dtype.itemsize
    d = int(shape[-1])
    n = int(np.prod(shape))
    L = int(scale_row.shape[-1])
    assert L % d == 0 and L % 128 == 0

    rows = _cdiv(n, L)
    pad = rows * L - n

    flat = x.reshape(-1)
    if pad:
        # Ragged tail only: pad < L elements so the (rows, L) reshape is legal.
        # Exact-multiple payloads skip this and both reshapes are free.
        flat = jnp.pad(flat, (0, pad))
    slab = flat.reshape(rows, L)

    # Sublane granularity: 8 (4-byte) / 16 (2-byte) / 32 (1-byte) dtypes.
    sub = max(8, 32 // max(itemsize, 1))
    # Byte-capped block rows (2x in + 2x out double buffers stay well inside
    # vmem_limit_bytes); for payloads big enough to split, keep at least
    # `target_min_blocks` grid steps so v7x's two TensorCores stay balanced.
    cap_rows = max(sub, (max_block_bytes // (L * itemsize)) // sub * sub)
    if rows > target_min_blocks * sub:
        cap_rows = min(cap_rows, _round_up(_cdiv(rows, target_min_blocks), sub))
    if rows <= sub:
        block_rows = rows                      # full-extent block (tiny payload)
    else:
        block_rows = min(cap_rows, (rows // sub) * sub)
    num_blocks = _cdiv(rows, block_rows)       # last block may be ragged

    out = pl.pallas_call(
        _norm_kernel,
        out_shape=jax.ShapeDtypeStruct((rows, L), dtype),
        grid=(num_blocks,),
        in_specs=[
            pl.BlockSpec((block_rows, L), lambda i: (i, 0)),
            pl.BlockSpec((1, L), lambda i: (0, 0)),   # resident across steps
            pl.BlockSpec((1, L), lambda i: (0, 0)),   # resident across steps
        ],
        out_specs=pl.BlockSpec((block_rows, L), lambda i: (i, 0)),
        compiler_params=pltpu.CompilerParams(
            dimension_semantics=("parallel",),
            vmem_limit_bytes=vmem_limit_bytes,
        ),
    )(slab, scale_row, bias_row)

    if pad:
        return out.reshape(-1)[:n].reshape(shape)
    return out.reshape(shape)


class InputNormPallas:
    """JAX/Pallas re-implementation of salt InputNorm.

    Normalisation parameters are generated deterministically in-script for
    each (input type, variable) instead of being loaded from a YAML file.
    """
    # TODO(synk): YAML norm-dict loading / input-map key validation is
    # host-side config handling, not a kernel concern; synthetic parameters
    # are used here.

    NO_NORM = ("EDGE", "PARAMETERS")

    def __init__(self, variables: dict, global_object: str, input_map=None):
        self.variables = variables
        self.global_object = global_object
        if input_map is None:
            input_map = {k: k for k in variables}
        self.input_map = input_map

        self.means = {}
        self.stds = {}
        self.scale_rows = {}   # (1, L) pre-tiled 1/std       (f32)
        self.bias_rows = {}    # (1, L) pre-tiled -mean/std   (f32)
        for k, vs in variables.items():
            if k in self.NO_NORM:
                continue
            d = len(vs)
            means = np.linspace(-1.0, 1.0, d, dtype=np.float32)
            stds = 0.5 + 0.1 * np.arange(1, d + 1, dtype=np.float32)
            assert np.isfinite(means).all() and np.isfinite(stds).all()
            assert not (stds == 0).any()
            self.means[k] = jnp.asarray(means)
            self.stds[k] = jnp.asarray(stds)
            # Fused affine form y = x*(1/std) + (-mean/std), pre-tiled to the
            # per-key lane width L = lcm(d, 128) so the lane pattern is
            # row-invariant in the (rows, L) slab. NOTE: differs from
            # (x-mean)/std by a few f32 ulps (cancellation in the final add).
            L = math.lcm(d, 128)
            scale = np.tile((1.0 / stds).astype(np.float32), L // d)
            bias = np.tile((-means / stds).astype(np.float32), L // d)
            self.scale_rows[k] = jnp.asarray(scale)[None, :]
            self.bias_rows[k] = jnp.asarray(bias)[None, :]

    def __call__(self, inputs: dict) -> dict:
        out = dict(inputs)
        for k, x in inputs.items():
            if k in self.NO_NORM or k not in self.scale_rows:
                continue
            if int(np.prod(x.shape)) == 0:
                continue
            out[k] = normalise_one(x, self.scale_rows[k], self.bias_rows[k])
        return out


if __name__ == "__main__":
    key = jax.random.PRNGKey(0)
    k1, k2, k3, k4 = jax.random.split(key, 4)

    # Synthetic variable specification (names only matter for counts).
    variables = {
        "GLOBAL": [f"g{i}" for i in range(4)],      # 4 global variables
        "TRACK": [f"t{i}" for i in range(6)],       # 6 track variables
        "EDGE": [f"e{i}" for i in range(3)],        # not normalised
        "PARAMETERS": [f"p{i}" for i in range(2)],  # not normalised
    }

    batch, n_tracks = 2, 8
    inputs = {
        "GLOBAL": jax.random.normal(k1, (batch, len(variables["GLOBAL"])), jnp.float32),
        "TRACK": jax.random.normal(k2, (batch, n_tracks, len(variables["TRACK"])), jnp.float32),
        "EDGE": jax.random.normal(k3, (batch, n_tracks, n_tracks, len(variables["EDGE"])), jnp.float32),
        "PARAMETERS": jax.random.normal(k4, (batch, len(variables["PARAMETERS"])), jnp.float32),
    }

    norm = InputNormPallas(variables, global_object="jets", input_map=None)
    outputs = norm(inputs)
    jax.block_until_ready(outputs)

    # Reference check (plain JAX broadcasting, same as the PyTorch forward).
    # Slightly looser tolerance: kernel uses x*(1/std) - mean/std (fused FMA
    # form) vs the reference (x-mean)/std; both f32, differ by a few ulps.
    for k, x in inputs.items():
        if k in InputNormPallas.NO_NORM:
            ref = x
        else:
            ref = (x - norm.means[k]) / norm.stds[k]
        np.testing.assert_allclose(np.asarray(outputs[k]), np.asarray(ref),
                                   rtol=1e-5, atol=1e-5)

    print("KERNEL_OK")
</pallas_src>

<mosaic_0001>
module attributes {stable_mosaic.version = 11 : i64} {
  func.func @_norm_kernel(%arg0: i32, %arg1: memref<1x128xf32, #tpu.memory_space<vmem>>, %arg2: memref<1x128xf32, #tpu.memory_space<vmem>>, %arg3: memref<1x128xf32, #tpu.memory_space<vmem>>, %arg4: memref<1x128xf32, #tpu.memory_space<vmem>>) attributes {dimension_semantics = [#tpu.dimension_semantics<parallel>], iteration_bounds = array<i64: 1>, scalar_prefetch = 0 : i64, scratch_operands = 0 : i64, tpu.core_type = #tpu.core_type<tc>, window_params = [{transform_indices = @transform_0, window_bounds = array<i64: 1, 128>}, {pipeline_mode = #tpu.pipeline_mode<synchronous>, transform_indices = @transform_1, window_bounds = array<i64: 1, 128>}, {pipeline_mode = #tpu.pipeline_mode<synchronous>, transform_indices = @transform_2, window_bounds = array<i64: 1, 128>}, {transform_indices = @transform_3, window_bounds = array<i64: 1, 128>}]} {
    %c0 = arith.constant 0 : index
    %c0_0 = arith.constant 0 : index
    %0 = vector.load %arg1[%c0, %c0_0] : memref<1x128xf32, #tpu.memory_space<vmem>>, vector<1x128xf32>
    %c0_1 = arith.constant 0 : index
    %c0_2 = arith.constant 0 : index
    %1 = vector.load %arg2[%c0_1, %c0_2] : memref<1x128xf32, #tpu.memory_space<vmem>>, vector<1x128xf32>
    %2 = arith.mulf %0, %1 : vector<1x128xf32>
    %c0_3 = arith.constant 0 : index
    %c0_4 = arith.constant 0 : index
    %3 = vector.load %arg3[%c0_3, %c0_4] : memref<1x128xf32, #tpu.memory_space<vmem>>, vector<1x128xf32>
    %4 = arith.addf %2, %3 : vector<1x128xf32>
    %c0_5 = arith.constant 0 : index
    %c0_6 = arith.constant 0 : index
    %5 = vector.load %arg4[%c0_5, %c0_6] : memref<1x128xf32, #tpu.memory_space<vmem>>, vector<1x128xf32>
    tpu.vector_store %arg4[%c0_5, %c0_6], %4 {strides = array<i32>} : memref<1x128xf32, #tpu.memory_space<vmem>>, vector<1x128xf32>,
    return
  }
  func.func @transform_0(%arg0: i32) -> (i32, i32) {
    %c0_i32 = arith.constant 0 : i32
    %c0_i32_0 = arith.constant 0 : i32
    return %arg0, %c0_i32 : i32, i32
  }
  func.func @transform_1(%arg0: i32) -> (i32, i32) {
    %c0_i32 = arith.constant 0 : i32
    %c0_i32_0 = arith.constant 0 : i32
    %c0_i32_1 = arith.constant 0 : i32
    return %c0_i32, %c0_i32_0 : i32, i32
  }
  func.func @transform_2(%arg0: i32) -> (i32, i32) {
    %c0_i32 = arith.constant 0 : i32
    %c0_i32_0 = arith.constant 0 : i32
    %c0_i32_1 = arith.constant 0 : i32
    return %c0_i32, %c0_i32_0 : i32, i32
  }
  func.func @transform_3(%arg0: i32) -> (i32, i32) {
    %c0_i32 = arith.constant 0 : i32
    %c0_i32_0 = arith.constant 0 : i32
    return %arg0, %c0_i32 : i32, i32
  }
}

</mosaic_0001>

<bundles_post_ra>
// kernel: tpu_custom_call.1
= control target key start
LH: loop header
LB: loop body
LE: loop exit
PB: predicated region body
PF: predicated region fallthrough
CT: control target
= control target key end

     0   :  { %8 = vsyncpa [#allocation3], 0  ;;  %s150_s0 = inlined_call_operand.hbm [shape: f32[1,128], index: 0, kind: input, shape index: {}]   ;;  %s151_s1 = inlined_call_operand.vmem [shape: f32[1,128], index: 1, kind: input, shape index: {}]   ;;  %s152_s2 = inlined_call_operand.vmem [shape: f32[1,128], index: 2, kind: input, shape index: {}]   ;;  %s153_s3 = inlined_call_operand.hbm [shape: f32[1,128], index: 3, kind: output, shape index: {}]  }
   0x1   :  { %9 = vsyncpa [#allocation4], 0  ;;  %s98_s12 = smov [#allocation2]   ;;  %s50_s16 = scalar_lea.hbm %s150_s0, 16 }
   0x2   :  { %s16_s13 = sshll.u32 %s98_s12, 4  ;;  %p51_p0 = scmp.ne.s32.totalorder %s150_s0, %s50_s16  ;;  %s17_s13 = int_to_ptr.vmem [resolvable:$true] %s16_s13 }
   0x3   :  { %p54_p1 = scmp.lt.u32.totalorder %s50_s16, %s150_s0 }
   0x5   :  { %p56_p2 = pnand %p54_p1, %p51_p0 }
   0x7   :  { %59 = shalt.err (!%p56_p2)
}
   0x8   :  { %s60_s21 = scalar_lea.vmem %s17_s13, 16  ;;  %s64_s22 = scalar_lea.vmem %s17_s13, 32 }
   0x9   :  { %p61_p3 = scmp.ne.s32.totalorder %s17_s13, %s60_s21  ;;  %p65_p4 = scmp.lt.s32.totalorder %s17_s13, %s17_s13 }
   0xa   :  { %p66_p5 = scmp.lt.s32.totalorder %s64_s22, %s60_s21 }
   0xc   :  { %p67_p6 = por %p66_p5, %p65_p4 }
   0xe   :  { %p68_p7 = pnand %p67_p6, %p61_p3 }
  0x10   :  { %71 = shalt.err (!%p68_p7)
}
  0x11   :  { %19 = dma.hbm_to_vmem [thread:$0]  %s150_s0, 16, %s17_s13, [#allocation3]  }
  0x12   :  { %94 = dma.done.wait [#allocation3], 16  }
  0x13   :  { %95 = vsyncadd [#allocation3], 4294967280  ;;  %s99_s25 = smov [#allocation5]   ;;  %v27_v0 = vld [vmem:[#allocation2] sm:$0x1] }
  0x14   :  { %s39_s26 = sshll.u32 %s99_s25, 4  ;;  %v28_v1 = vld [vmem:[%s151_s1] sm:$0x1]  ;;  %s40_s26 = int_to_ptr.vmem [resolvable:$true] %s39_s26 }
  0x15   :  { %v30_v2 = vld [vmem:[%s152_s2] sm:$0x1]  ;;  %v29_v3 = vmul.f32 %v28_v1, %v27_v0  ;;  %s72_s4 = scalar_lea.vmem %s40_s26, 16  ;;  %s76_s0 = scalar_lea.vmem %s40_s26, 32 }
  0x16   :  { %p73_p8 = scmp.ne.s32.totalorder %s40_s26, %s72_s4  ;;  %p77_p9 = scmp.lt.s32.totalorder %s40_s26, %s40_s26 }
  0x17   :  { %v31_v4 = vadd.f32 %v30_v2, %v29_v3  ;;  %p78_p10 = scmp.lt.s32.totalorder %s76_s0, %s72_s4 }
  0x19   :  { %32 = vst [vmem:[#allocation5] sm:$0x1] %v31_v4  ;;  %p79_p11 = por %p78_p10, %p77_p9 }
  0x1b   :  { %p80_p12 = pnand %p79_p11, %p73_p8 }
  0x1d   :  { %83 = shalt.err (!%p80_p12)
}
  0x1e   :  { %s84_s1 = scalar_lea.hbm %s153_s3, 16 }
  0x1f   :  { %p85_p13 = scmp.ne.s32.totalorder %s153_s3, %s84_s1  ;;  %p88_p0 = scmp.lt.u32.totalorder %s84_s1, %s153_s3 }
  0x21   :  { %p90_p1 = pnand %p88_p0, %p85_p13 }
  0x23   :  { %93 = shalt.err (!%p90_p1)
}
  0x24   :  { %42 = dma.vmem_to_hbm [thread:$0]  %s40_s26, 16, %s153_s3, [#allocation4]  }
  0x25   :  { %96 = dma.done.wait [#allocation4], 16  }
  0x26   :  { %97 = vsyncadd [#allocation4], 4294967280 }
  0x27   :  { %46 = vsyncpa [#allocation3], 1 }
  0x28   :  { %47 = vsyncpa [#allocation4], 1 }

</bundles_post_ra>
